<compile_context>
chip_gen: v7x
topology: tpu7x:2x2x1
jax: 0.10.0
libtpu: 0.0.40
codegen_flags: <defaults>
</compile_context>

<pallas_src>
import math

import jax
import jax.numpy as jnp
from jax.experimental import pallas as pl
from jax.experimental.pallas import tpu as pltpu

# Small shapes consistent with the module: (batch, seq, d_model), d_ff = 2 * d_model.
B, S, D, DFF = 2, 8, 32, 64

_VMEM_TARGET = 40 * 1024 * 1024  # conservative vs v7x's 64 MiB physical VMEM per TC


def _erf(z):
    """Abramowitz & Stegun 7.1.26 rational approximation, |error| <= 1.5e-7."""
    a1, a2, a3, a4, a5 = (0.254829592, -0.284496736, 1.421413741,
                          -1.453152027, 1.061405429)
    p = 0.3275911
    sgn = jnp.where(z < 0.0, -1.0, 1.0)
    az = jnp.abs(z)
    # divide -> EUP reciprocal (frees the VALU slot; EUP otherwise only carries exp)
    t = pl.reciprocal(1.0 + p * az, approx=True)
    poly = ((((a5 * t + a4) * t + a3) * t + a2) * t + a1) * t
    return sgn * (1.0 - poly * jnp.exp(-az * az))


def _gelu_exact(v):
    # exact (erf-based) GELU, matching torch.nn.GELU() default; f32 math only.
    return 0.5 * v * (1.0 + _erf(v * 0.7071067811865476))


def ffn_kernel(x_ref, w1_ref, b1_ref, w2_ref, b2_ref, o_ref):
    # x/w1/w2 may be bf16 (wrapper casts); accumulation is always f32 via
    # preferred_element_type.  Biases stay f32.
    h = jnp.dot(x_ref[...], w1_ref[...],
                preferred_element_type=jnp.float32) + b1_ref[...]       # (tile, DFF) f32
    h = _gelu_exact(h)                                                   # f32 VPU/EUP
    # nn.Dropout in eval mode == identity.
    # TODO(synk): training-mode dropout (pltpu.prng_seed / stateful_bernoulli) not implemented.
    h = h.astype(w2_ref.dtype)                                           # bf16 for 2nd MXU pass
    o_ref[...] = (jnp.dot(h, w2_ref[...], preferred_element_type=jnp.float32)
                  + b2_ref[...]).astype(o_ref.dtype)


def _round_up(a, m):
    return ((a + m - 1) // m) * m


def _vmem_budget(tile, d, dff, op_bytes):
    """Rough per-call VMEM bytes: double-buffered streamed arrays + resident weights."""
    x_b = tile * d * op_bytes
    o_b = tile * d * 4
    w_b = (d * dff + dff * d) * op_bytes
    bias_b = (dff + d) * 4
    h_b = tile * dff * (4 + op_bytes)        # f32 intermediate + its narrow cast
    return 2 * (x_b + o_b + w_b + bias_b) + h_b


def _choose_row_tile(n, d, dff, op_bytes, max_row_tile):
    """Largest row tile (multiple of 8, <= max_row_tile) fitting the VMEM target."""
    tile = min(_round_up(n, 8), _round_up(max_row_tile, 8))
    while tile > 8 and _vmem_budget(tile, d, dff, op_bytes) > _VMEM_TARGET:
        tile = _round_up(tile // 2, 8)
    return tile


def feed_forward(x, params, *, matmul_dtype=jnp.bfloat16, max_row_tile=1024):
    """x: (B, S, D) float32.  params = (w1 (D,DFF), b1 (1,DFF), w2 (DFF,D), b2 (1,D))."""
    w1, b1, w2, b2 = params
    b_, s_, d_ = x.shape
    dff = w1.shape[1]
    n = b_ * s_

    op_bytes = jnp.dtype(matmul_dtype).itemsize
    tile = _choose_row_tile(n, d_, dff, op_bytes, max_row_tile)
    n_pad = _round_up(n, tile)

    x2 = x.reshape(n, d_)                       # wrapper-side layout plumbing only
    if n_pad != n:
        x2 = jnp.pad(x2, ((0, n_pad - n), (0, 0)))

    # bf16 MXU operands (f32 accumulation in-kernel): 3-6x MXU throughput, 2x less
    # weight DMA/VMEM.  Biases stay f32 (added to the f32 accumulator).
    x2 = x2.astype(matmul_dtype)
    w1c = w1.astype(matmul_dtype)
    w2c = w2.astype(matmul_dtype)

    grid = (n_pad // tile,)

    cost = pl.CostEstimate(
        flops=4 * n_pad * d_ * dff + 15 * n_pad * dff,      # 2 matmuls + GELU chain
        transcendentals=2 * n_pad * dff,                    # exp + reciprocal per hidden elem
        bytes_accessed=(x2.size * op_bytes + (w1c.size + w2c.size) * op_bytes
                        + (b1.size + b2.size) * 4 + n_pad * d_ * 4),
    )

    budget = _vmem_budget(tile, d_, dff, op_bytes)
    vmem_limit = int(min(56 * 1024 * 1024, max(32 * 1024 * 1024, budget + 8 * 1024 * 1024)))

    out = pl.pallas_call(
        ffn_kernel,
        out_shape=jax.ShapeDtypeStruct((n_pad, d_), jnp.float32),
        grid_spec=pltpu.PrefetchScalarGridSpec(
            num_scalar_prefetch=0,
            grid=grid,
            in_specs=[
                pl.BlockSpec((tile, d_), lambda i: (i, 0)),    # x rows: streamed
                pl.BlockSpec((d_, dff), lambda i: (0, 0)),     # w1: VMEM-resident
                pl.BlockSpec((1, dff), lambda i: (0, 0)),      # b1: VMEM-resident
                pl.BlockSpec((dff, d_), lambda i: (0, 0)),     # w2: VMEM-resident
                pl.BlockSpec((1, d_), lambda i: (0, 0)),       # b2: VMEM-resident
            ],
            out_specs=pl.BlockSpec((tile, d_), lambda i: (i, 0)),
        ),
        compiler_params=pltpu.CompilerParams(
            dimension_semantics=("parallel",),                 # megacore sharding (v7x)
            vmem_limit_bytes=vmem_limit,
        ),
        cost_estimate=cost,
    )(x2, w1c, b1, w2c, b2)

    return out[:n].reshape(b_, s_, d_)


def feed_forward_ref(x, params):
    """Pure-JAX reference matching the PyTorch module (eval mode), f32 / HIGHEST."""
    w1, b1, w2, b2 = params
    hp = jax.lax.Precision.HIGHEST
    h = jax.nn.gelu(jnp.dot(x, w1, precision=hp) + b1, approximate=False)
    return jnp.dot(h, w2, precision=hp) + b2


def make_params(key):
    k1, k2, k3, k4 = jax.random.split(key, 4)
    lim1 = 1.0 / math.sqrt(D)     # PyTorch nn.Linear default init bounds
    lim2 = 1.0 / math.sqrt(DFF)
    w1 = jax.random.uniform(k1, (D, DFF), jnp.float32, -lim1, lim1)
    b1 = jax.random.uniform(k2, (1, DFF), jnp.float32, -lim1, lim1)
    w2 = jax.random.uniform(k3, (DFF, D), jnp.float32, -lim2, lim2)
    b2 = jax.random.uniform(k4, (1, D), jnp.float32, -lim2, lim2)
    return (w1, b1, w2, b2)


if __name__ == "__main__":
    key = jax.random.PRNGKey(0)
    kx, kp = jax.random.split(key)
    x = jax.random.normal(kx, (B, S, D), jnp.float32)
    params = make_params(kp)

    ref = feed_forward_ref(x, params)

    # Default (optimized) path: bf16 MXU operands, f32 accumulation.  Tolerance is
    # set by bf16 operand rounding (~2^-8 relative), not by the kernel structure.
    out_bf16 = feed_forward(x, params)
    jax.block_until_ready(out_bf16)
    assert out_bf16.shape == (B, S, D)
    assert out_bf16.dtype == jnp.float32
    err_bf16 = float(jnp.max(jnp.abs(out_bf16 - ref)))
    assert jnp.allclose(out_bf16, ref, atol=2e-2, rtol=2e-2), err_bf16

    # f32-operand path: tighter parity check.  Residual slack covers the A&S erf
    # (<=1.5e-7), the EUP approx reciprocal, and Mosaic's f32 matmul passes.
    out_f32 = feed_forward(x, params, matmul_dtype=jnp.float32)
    jax.block_until_ready(out_f32)
    err_f32 = float(jnp.max(jnp.abs(out_f32 - ref)))
    assert jnp.allclose(out_f32, ref, atol=1e-2, rtol=1e-2), err_f32

    print("KERNEL_OK")
</pallas_src>

<mosaic_0001>
module attributes {stable_mosaic.version = 11 : i64} {
  func.func @ffn_kernel(%arg0: i32, %arg1: memref<16x32xbf16, #tpu.memory_space<vmem>>, %arg2: memref<32x64xbf16, #tpu.memory_space<vmem>>, %arg3: memref<1x64xf32, #tpu.memory_space<vmem>>, %arg4: memref<64x32xbf16, #tpu.memory_space<vmem>>, %arg5: memref<1x32xf32, #tpu.memory_space<vmem>>, %arg6: memref<16x32xf32, #tpu.memory_space<vmem>>) attributes {dimension_semantics = [#tpu.dimension_semantics<parallel>], iteration_bounds = array<i64: 1>, scalar_prefetch = 0 : i64, scratch_operands = 0 : i64, tpu.core_type = #tpu.core_type<tc>, window_params = [{transform_indices = @transform_0, window_bounds = array<i64: 16, 32>}, {pipeline_mode = #tpu.pipeline_mode<synchronous>, transform_indices = @transform_1, window_bounds = array<i64: 32, 64>}, {pipeline_mode = #tpu.pipeline_mode<synchronous>, transform_indices = @transform_2, window_bounds = array<i64: 1, 64>}, {pipeline_mode = #tpu.pipeline_mode<synchronous>, transform_indices = @transform_3, window_bounds = array<i64: 64, 32>}, {pipeline_mode = #tpu.pipeline_mode<synchronous>, transform_indices = @transform_4, window_bounds = array<i64: 1, 32>}, {transform_indices = @transform_5, window_bounds = array<i64: 16, 32>}]} {
    %c0 = arith.constant 0 : index
    %c0_0 = arith.constant 0 : index
    %0 = vector.load %arg1[%c0, %c0_0] : memref<16x32xbf16, #tpu.memory_space<vmem>>, vector<16x32xbf16>
    %c0_1 = arith.constant 0 : index
    %c0_2 = arith.constant 0 : index
    %1 = vector.load %arg2[%c0_1, %c0_2] : memref<32x64xbf16, #tpu.memory_space<vmem>>, vector<32x64xbf16>
    %cst = arith.constant dense<0.000000e+00> : vector<16x64xf32>
    %2 = tpu.matmul %0, %1, %cst {dimension_numbers = #tpu.dot_dimension_numbers<[1], [0], [0], [1], [0, 0, 1, 1], [], []>} : vector<16x32xbf16>, vector<32x64xbf16>, vector<16x64xf32> -> vector<16x64xf32>
    %c0_3 = arith.constant 0 : index
    %c0_4 = arith.constant 0 : index
    %3 = vector.load %arg3[%c0_3, %c0_4] : memref<1x64xf32, #tpu.memory_space<vmem>>, vector<1x64xf32>
    %4 = vector.broadcast %3 : vector<1x64xf32> to vector<16x64xf32>
    %5 = arith.addf %2, %4 : vector<16x64xf32>
    %cst_5 = arith.constant 5.000000e-01 : f32
    %6 = vector.broadcast %cst_5 : f32 to vector<16x64xf32>
    %7 = arith.mulf %6, %5 : vector<16x64xf32>
    %cst_6 = arith.constant 0.707106769 : f32
    %8 = vector.broadcast %cst_6 : f32 to vector<16x64xf32>
    %9 = arith.mulf %5, %8 : vector<16x64xf32>
    %cst_7 = arith.constant 0.000000e+00 : f32
    %10 = vector.broadcast %cst_7 : f32 to vector<16x64xf32>
    %11 = arith.cmpf olt, %9, %10 : vector<16x64xf32>
    %cst_8 = arith.constant -1.000000e+00 : f32
    %cst_9 = arith.constant 1.000000e+00 : f32
    %12 = vector.broadcast %cst_8 : f32 to vector<16x64xf32>
    %13 = vector.broadcast %cst_9 : f32 to vector<16x64xf32>
    %14 = arith.select %11, %12, %13 : vector<16x64xi1>, vector<16x64xf32>
    %15 = math.absf %9 : vector<16x64xf32>
    %cst_10 = arith.constant 0.327591091 : f32
    %16 = vector.broadcast %cst_10 : f32 to vector<16x64xf32>
    %17 = arith.mulf %16, %15 : vector<16x64xf32>
    %cst_11 = arith.constant 1.000000e+00 : f32
    %18 = vector.broadcast %cst_11 : f32 to vector<16x64xf32>
    %19 = arith.addf %18, %17 : vector<16x64xf32>
    %20 = tpu.reciprocal %19 {approx = true} : vector<16x64xf32> -> vector<16x64xf32>
    %cst_12 = arith.constant 1.06140542 : f32
    %21 = vector.broadcast %cst_12 : f32 to vector<16x64xf32>
    %22 = arith.mulf %21, %20 : vector<16x64xf32>
    %cst_13 = arith.constant -1.45315206 : f32
    %23 = vector.broadcast %cst_13 : f32 to vector<16x64xf32>
    %24 = arith.addf %22, %23 : vector<16x64xf32>
    %25 = arith.mulf %24, %20 : vector<16x64xf32>
    %cst_14 = arith.constant 1.42141378 : f32
    %26 = vector.broadcast %cst_14 : f32 to vector<16x64xf32>
    %27 = arith.addf %25, %26 : vector<16x64xf32>
    %28 = arith.mulf %27, %20 : vector<16x64xf32>
    %cst_15 = arith.constant -0.284496725 : f32
    %29 = vector.broadcast %cst_15 : f32 to vector<16x64xf32>
    %30 = arith.addf %28, %29 : vector<16x64xf32>
    %31 = arith.mulf %30, %20 : vector<16x64xf32>
    %cst_16 = arith.constant 0.254829586 : f32
    %32 = vector.broadcast %cst_16 : f32 to vector<16x64xf32>
    %33 = arith.addf %31, %32 : vector<16x64xf32>
    %34 = arith.mulf %33, %20 : vector<16x64xf32>
    %cst_17 = arith.constant 0.000000e+00 : f32
    %35 = vector.broadcast %cst_17 : f32 to vector<16x64xf32>
    %36 = arith.subf %35, %15 : vector<16x64xf32>
    %37 = arith.mulf %36, %15 : vector<16x64xf32>
    %38 = math.exp %37 : vector<16x64xf32>
    %39 = arith.mulf %34, %38 : vector<16x64xf32>
    %cst_18 = arith.constant 1.000000e+00 : f32
    %40 = vector.broadcast %cst_18 : f32 to vector<16x64xf32>
    %41 = arith.subf %40, %39 : vector<16x64xf32>
    %42 = arith.mulf %14, %41 : vector<16x64xf32>
    %cst_19 = arith.constant 1.000000e+00 : f32
    %43 = vector.broadcast %cst_19 : f32 to vector<16x64xf32>
    %44 = arith.addf %43, %42 : vector<16x64xf32>
    %45 = arith.mulf %7, %44 : vector<16x64xf32>
    %46 = arith.truncf %45 : vector<16x64xf32> to vector<16x64xbf16>
    %c0_20 = arith.constant 0 : index
    %c0_21 = arith.constant 0 : index
    %47 = vector.load %arg4[%c0_20, %c0_21] : memref<64x32xbf16, #tpu.memory_space<vmem>>, vector<64x32xbf16>
    %cst_22 = arith.constant dense<0.000000e+00> : vector<16x32xf32>
    %48 = tpu.matmul %46, %47, %cst_22 {dimension_numbers = #tpu.dot_dimension_numbers<[1], [0], [0], [1], [0, 0, 1, 1], [], []>} : vector<16x64xbf16>, vector<64x32xbf16>, vector<16x32xf32> -> vector<16x32xf32>
    %c0_23 = arith.constant 0 : index
    %c0_24 = arith.constant 0 : index
    %49 = vector.load %arg5[%c0_23, %c0_24] : memref<1x32xf32, #tpu.memory_space<vmem>>, vector<1x32xf32>
    %50 = vector.broadcast %49 : vector<1x32xf32> to vector<16x32xf32>
    %51 = arith.addf %48, %50 : vector<16x32xf32>
    %c0_25 = arith.constant 0 : index
    %c0_26 = arith.constant 0 : index
    %52 = vector.load %arg6[%c0_25, %c0_26] : memref<16x32xf32, #tpu.memory_space<vmem>>, vector<16x32xf32>
    tpu.vector_store %arg6[%c0_25, %c0_26], %51 {strides = array<i32>} : memref<16x32xf32, #tpu.memory_space<vmem>>, vector<16x32xf32>,
    return
  }
  func.func @transform_0(%arg0: i32) -> (i32, i32) {
    %c0_i32 = arith.constant 0 : i32
    %c0_i32_0 = arith.constant 0 : i32
    return %arg0, %c0_i32 : i32, i32
  }
  func.func @transform_1(%arg0: i32) -> (i32, i32) {
    %c0_i32 = arith.constant 0 : i32
    %c0_i32_0 = arith.constant 0 : i32
    %c0_i32_1 = arith.constant 0 : i32
    return %c0_i32, %c0_i32_0 : i32, i32
  }
  func.func @transform_2(%arg0: i32) -> (i32, i32) {
    %c0_i32 = arith.constant 0 : i32
    %c0_i32_0 = arith.constant 0 : i32
    %c0_i32_1 = arith.constant 0 : i32
    return %c0_i32, %c0_i32_0 : i32, i32
  }
  func.func @transform_3(%arg0: i32) -> (i32, i32) {
    %c0_i32 = arith.constant 0 : i32
    %c0_i32_0 = arith.constant 0 : i32
    %c0_i32_1 = arith.constant 0 : i32
    return %c0_i32, %c0_i32_0 : i32, i32
  }
  func.func @transform_4(%arg0: i32) -> (i32, i32) {
    %c0_i32 = arith.constant 0 : i32
    %c0_i32_0 = arith.constant 0 : i32
    %c0_i32_1 = arith.constant 0 : i32
    return %c0_i32, %c0_i32_0 : i32, i32
  }
  func.func @transform_5(%arg0: i32) -> (i32, i32) {
    %c0_i32 = arith.constant 0 : i32
    %c0_i32_0 = arith.constant 0 : i32
    return %arg0, %c0_i32 : i32, i32
  }
}

</mosaic_0001>

<bundles_post_ra>
// kernel: tpu_custom_call.1
= control target key start
LH: loop header
LB: loop body
LE: loop exit
PB: predicated region body
PF: predicated region fallthrough
CT: control target
= control target key end

     0   :  { %v336_v1 = vmov 0.0   ;;  %vm337_vm0 = vmmov 0   ;;  %vm52_vm1 = vcmask 261120   ;;  %s414_s0 = inlined_call_operand.vmem [shape: bf16[16,32], index: 0, kind: input, shape index: {}]   ;;  %s415_s1 = inlined_call_operand.vmem [shape: bf16[32,64], index: 1, kind: input, shape index: {}]   ;;  %s416_s2 = inlined_call_operand.vmem [shape: f32[1,64], index: 2, kind: input, shape index: {}]   ;;  %s417_s3 = inlined_call_operand.vmem [shape: bf16[64,32], index: 3, kind: input, shape index: {}]   ;;  %s418_s4 = inlined_call_operand.vmem [shape: f32[1,32], index: 4, kind: input, shape index: {}]   ;;  %s419_s5 = inlined_call_operand.hbm [shape: f32[16,32], index: 5, kind: output, shape index: {}]  }
   0x1   :  { %v297_v0 = vld [vmem:[%s415_s1] sm:$0xff]   ;;  %271 = vmatprep.subr.bf16.mxu0 %v336_v1  ;;  %279 = vmatprep.subr.bf16.mxu1 %v336_v1  ;;  %v298_v2 = vld [vmem:[%s415_s1 + $0x8] sm:$0xff]  }
   0x2   :  { %272 = vmatpush3.bf16.msra.mxu0 %v297_v0  ;;  %275 = vmatprep.mubr.msk.bf16.mxu0 %vm337_vm0, %v336_v1  ;;  %v299_v3 = vld [vmem:[%s414_s0] sm:$0xff]  }
   0x3   :  { %273 = vmatprep.subr.bf16.mxu0 %v336_v1  ;;  %287 = vmatprep.mubr.msk.bf16.mxu1 %vm337_vm0, %v336_v1 }
   0x6   :  { %274 = vmatpush3.bf16.msra.mxu0 %v298_v2 }
   0x7   :  { %10 = vsyncpa [#allocation3], 0  ;;  %v300_v4 = vld [vmem:[%s417_s3] sm:$0xff]   ;;  %v301_v5 = vld [vmem:[%s417_s3 + $0x8] sm:$0xff]   ;;  %v338_v53 = vmov 1.0   ;;  %vm189_vm4 = vcmask 523264  }
   0x8   :  { %280 = vmatpush3.bf16.msra.mxu1 %v300_v4  ;;  %v302_v6 = vld [vmem:[%s417_s3 + $0x10] sm:$0xff]   ;;  %v303_v7 = vld [vmem:[%s417_s3 + $0x18] sm:$0xff]   ;;  %v252_v8 = vld [vmem:[%s416_s2] ss:$0 sm:$0xff]  ;;  %s339_s7 = smov [#allocation2]  }
   0x9   :  { %276 = vmatmul.mubr.msk.bf16.vlgmr.msra.gmra.mrb[0].mxu0 %vm52_vm1, %v299_v3  ;;  %281 = vmatprep.subr.bf16.mxu1 %v336_v1  ;;  %v257_v3 = vld [vmem:[%s418_s4] ss:$0 sm:$0xff]  ;;  %s241_s8 = sshll.u32 %s339_s7, 4  ;;  %s242_s8 = int_to_ptr.vmem [resolvable:$true] %s241_s8 }
   0xa   :  { %s312_s9 = scalar_lea.vmem %s242_s8, 256  ;;  %p317_p1 = scmp.lt.s32.totalorder %s242_s8, %s242_s8 }
   0xb   :  { %p313_p0 = scmp.ne.s32.totalorder %s242_s8, %s312_s9  ;;  %p318_p2 = scmp.lt.s32.totalorder %s312_s9, %s312_s9 }
   0xc   :  { %282 = vmatpush3.bf16.msra.mxu1 %v301_v5 }
   0xd   :  { %283 = vmatprep.subr.bf16.mxu1 %v336_v1  ;;  %p319_p3 = por %p318_p2, %p317_p1 }
   0xf   :  { %p320_p4 = pnand %p319_p3, %p313_p0 }
  0x10   :  { %284 = vmatpush3.bf16.msra.mxu1 %v302_v6 }
  0x11   :  { %285 = vmatprep.subr.bf16.mxu1 %v336_v1 }
  0x14   :  { %286 = vmatpush3.bf16.msra.mxu1 %v303_v7 }
  0xdc   :  { %v90_v9 = vpop.f32.mrb[0].mxu0 }
  0xdd   :  { %v91_v10 = vadd.f32 %v252_v8, %v90_v9  ;;  %v277_v11 = vpop.f32.mrb[1].mxu0 }
  0xde   :  { %v93_v12 = vpop.f32.mrb[2].mxu0 }
  0xdf   :  { %v99_v13 = vmul.f32 0.70710677, %v91_v10  ;;  %v94_v14 = vadd.f32 %v252_v8, %v93_v12  ;;  %v278_v15 = vpop.f32.mrb[3].mxu0  ;;  %v97_v61 = vmul.f32 0.5, %v91_v10 }
  0xe1   :  { %v105_v16 = vand.u32 2147483647, %v99_v13  ;;  %v100_v17 = vmul.f32 0.70710677, %v94_v14  ;;  %vm101_vm2 = vcmp.lt.f32.partialorder %v99_v13, 0.0  ;;  %v98_v62 = vmul.f32 0.5, %v94_v14 }
  0xe2   :  { %v103_v54 = vsel %vm101_vm2, -1.0, %v338_v53 }
  0xe3   :  { %v107_v18 = vmul.f32 0.3275911, %v105_v16  ;;  %v106_v19 = vand.u32 2147483647, %v100_v17  ;;  %v131_v23 = vsub.f32 0.0, %v105_v16  ;;  %vm102_vm3 = vcmp.lt.f32.partialorder %v100_v17, 0.0 }
  0xe4   :  { %v104_v58 = vsel %vm102_vm3, -1.0, %v338_v53 }
  0xe5   :  { %v109_v20 = vadd.f32 1.0, %v107_v18  ;;  %v108_v21 = vmul.f32 0.3275911, %v106_v19  ;;  %v132_v24 = vsub.f32 0.0, %v106_v19  ;;  %v133_v26 = vmul.f32 %v131_v23, %v105_v16 }
  0xe7   :  { %304 = vrcp.f32 %v109_v20  ;;  %v110_v22 = vadd.f32 1.0, %v108_v21  ;;  %v134_v30 = vmul.f32 %v132_v24, %v106_v19  ;;  %v135_v31 = vmul.f32 1.442695, %v133_v26 }
  0xe9   :  { %306 = vrcp.f32 %v110_v22  ;;  %v137_v36 = vmul.f32 1.442695, %v134_v30 }
  0xea   :  { %308 = vpow2.f32 %v135_v31 }
  0xeb   :  { %310 = vpow2.f32 %v137_v36 }
  0xf1   :  { %v305_v25 = vpop.eup %304 }
  0xf2   :  { %v113_v27 = vmul.f32 1.0614054, %v305_v25 }
  0xf3   :  { %v307_v28 = vpop.eup %306 }
  0xf4   :  { %v115_v29 = vadd.f32 -1.4531521, %v113_v27  ;;  %v114_v32 = vmul.f32 1.0614054, %v307_v28  ;;  %v309_v47 = vpop.eup %308 }
  0xf5   :  { %v311_v51 = vpop.eup %310 }
  0xf6   :  { %v117_v33 = vmul.f32 %v305_v25, %v115_v29  ;;  %v116_v34 = vadd.f32 -1.4531521, %v114_v32 }
  0xf8   :  { %v119_v35 = vadd.f32 1.4214138, %v117_v33  ;;  %v118_v37 = vmul.f32 %v307_v28, %v116_v34 }
  0xfa   :  { %v121_v38 = vmul.f32 %v305_v25, %v119_v35  ;;  %v120_v39 = vadd.f32 1.4214138, %v118_v37 }
  0xfc   :  { %v123_v40 = vadd.f32 -0.28449672, %v121_v38  ;;  %v122_v41 = vmul.f32 %v307_v28, %v120_v39 }
  0xfe   :  { %v125_v42 = vmul.f32 %v305_v25, %v123_v40  ;;  %v124_v43 = vadd.f32 -0.28449672, %v122_v41 }
 0x100   :  { %v127_v44 = vadd.f32 0.2548296, %v125_v42  ;;  %v126_v45 = vmul.f32 %v307_v28, %v124_v43 }
 0x102   :  { %v129_v46 = vmul.f32 %v305_v25, %v127_v44  ;;  %v128_v48 = vadd.f32 0.2548296, %v126_v45 }
 0x104   :  { %v139_v49 = vmul.f32 %v309_v47, %v129_v46  ;;  %v130_v50 = vmul.f32 %v307_v28, %v128_v48 }
 0x106   :  { %v141_v52 = vsub.f32 1.0, %v139_v49  ;;  %v140_v55 = vmul.f32 %v311_v51, %v130_v50 }
 0x108   :  { %v143_v56 = vmul.f32 %v141_v52, %v103_v54  ;;  %v142_v57 = vsub.f32 1.0, %v140_v55 }
 0x10a   :  { %v145_v59 = vadd.f32 1.0, %v143_v56  ;;  %v144_v60 = vmul.f32 %v142_v57, %v104_v58 }
 0x10c   :  { %v146_v63 = vadd.f32 1.0, %v144_v60  ;;  %v147_v0 = vmul.f32 %v145_v59, %v97_v61 }
 0x10e   :  { %v148_v1 = vmul.f32 %v146_v63, %v98_v62 }
 0x110   :  { %v149_v2 = vpack.c.bf16 %v148_v1, %v147_v0 }
 0x112   :  { %288 = vmatmul.mubr.msk.bf16.vlgmr.msra.gmra.mrb[0].mxu1 %vm189_vm4, %v149_v2 }
 0x1e5   :  { %v227_v4 = vpop.f32.mrb[0].mxu1 }
 0x1e6   :  { %v228_v5 = vadd.f32 %v257_v3, %v227_v4  ;;  %v289_v6 = vpop.f32.mrb[1].mxu1 }
 0x1e7   :  { %v230_v7 = vpop.f32.mrb[2].mxu1 }
 0x1e8   :  { %234 = vst.msk [vmem:[#allocation2] sm:$0xff] %vm52_vm1, %v228_v5  ;;  %v231_v8 = vadd.f32 %v257_v3, %v230_v7  ;;  %v290_v9 = vpop.f32.mrb[3].mxu1 }
 0x1ea   :  { %235 = vst.msk [vmem:[#allocation2 + $0x8] sm:$0xff] %vm52_vm1, %v231_v8 }
 0x1eb   :  { %323 = shalt.err (!%p320_p4)
}
 0x1ec   :  { %s324_s11 = scalar_lea.hbm %s419_s5, 256 }
 0x1ed   :  { %p325_p5 = scmp.ne.s32.totalorder %s419_s5, %s324_s11  ;;  %p328_p6 = scmp.lt.u32.totalorder %s324_s11, %s419_s5 }
 0x1ef   :  { %p330_p7 = pnand %p328_p6, %p325_p5 }
 0x1f1   :  { %333 = shalt.err (!%p330_p7)
}
 0x1f2   :  { %s340_s16 = smov 128   ;;  %s341_s17 = smov 8  }
 0x1f3   :  { %247 = dma.vmem_to_hbm [thread:$0]  %s242_s8, 256, %s419_s5, [#allocation3], %s340_s16, %s340_s16, %s341_s17  }
 0x1f4   :  { %334 = dma.done.wait [#allocation3], 256  }
 0x1f5   :  { %335 = vsyncadd [#allocation3], 4294967040 }
 0x1f6   :  { %251 = vsyncpa [#allocation3], 1 }

</bundles_post_ra>
